<compile_context>
chip_gen: v7x
topology: tpu7x:2x2x1
jax: 0.10.0
libtpu: 0.0.40
codegen_flags: <defaults>
</compile_context>

<pallas_src>
import math
import numpy as np
import jax
import jax.numpy as jnp
from jax.experimental import pallas as pl
from jax.experimental.pallas import tpu as pltpu


def _largest_divisor_leq(n: int, target: int) -> int:
    d = max(1, min(n, target))
    while n % d:
        d -= 1
    return d


def _pick_tile(S: int, target: int, mults) -> int:
    """Largest divisor of S that is <= target and a multiple of one of `mults`
    (tried in order); falls back to the full extent S (always legal)."""
    for m in mults:
        c = (min(target, S) // m) * m
        while c >= m:
            if S % c == 0:
                return c
            c -= m
    return S


def _is_strict_causal(m4, S: int) -> bool:
    """True iff mask is concrete, broadcasts over batch/head, and equals the
    strict upper-triangular (future-position) 0/1 indicator."""
    if m4.shape[0] != 1 or m4.shape[1] != 1:
        return False
    if m4.shape[-2] != S or m4.shape[-1] != S:
        return False
    try:
        mm = np.asarray(jax.device_get(m4)).astype(np.float32).reshape(S, S)
    except Exception:
        return False   # traced mask -> cannot inspect, use the streamed path
    return bool(np.array_equal(mm, np.triu(np.ones((S, S), np.float32), 1)))


def _make_kernel(mode: str, scale: float, TQ: int, TK: int):
    has_bias = (mode == "bias")
    is_causal = (mode == "causal")

    def kernel(*args):
        if has_bias:
            q_ref, k_ref, v_ref, b_ref, o_ref, m_sc, l_sc, acc_sc, q_sc = args
        else:
            q_ref, k_ref, v_ref, o_ref, m_sc, l_sc, acc_sc, q_sc = args
            b_ref = None

        qi = pl.program_id(1)
        kv = pl.program_id(2)

        @pl.when(kv == 0)
        def _():
            m_sc[...] = jnp.full_like(m_sc, -jnp.inf)
            l_sc[...] = jnp.zeros_like(l_sc)
            acc_sc[...] = jnp.zeros_like(acc_sc)
            # q block is resident across the whole kv axis: scale it once here
            # instead of re-doing G*TQ*D multiplies every kv step.
            q_sc[...] = q_ref[...] * scale

        def compute():
            q = q_sc[...]                   # (G, TQ, D), pre-scaled
            k = k_ref[...]                  # (G, TK, D)
            v = v_ref[...]                  # (G, TK, D)

            # q @ k^T contracting the minor (D) dims (no relayout), f32 acc.
            s = jnp.einsum("gqd,gkd->gqk", q, k,
                           preferred_element_type=jnp.float32)   # (G, TQ, TK)

            if has_bias:
                # bias = mask * -10000 pre-baked (bf16) on the XLA side.
                s = s + b_ref[...].astype(jnp.float32)
            if is_causal:
                # In-kernel causal bias: zero HBM mask traffic.
                row = jax.lax.broadcasted_iota(jnp.int32, (TQ, TK), 0) + qi * TQ
                col = jax.lax.broadcasted_iota(jnp.int32, (TQ, TK), 1) + kv * TK
                s = s + jnp.where(col > row, jnp.float32(-10000.0),
                                  jnp.float32(0.0))

            # Online (flash) softmax update.
            m_prev = m_sc[...]                                        # (G,TQ,1)
            m_new = jnp.maximum(m_prev, jnp.max(s, axis=-1, keepdims=True))
            alpha = jnp.exp(m_prev - m_new)
            p = jnp.exp(s - m_new)                                    # (G,TQ,TK)
            l_sc[...] = alpha * l_sc[...] + jnp.sum(p, axis=-1, keepdims=True)
            acc_sc[...] = alpha * acc_sc[...] + jnp.einsum(
                "gqk,gkd->gqd", p.astype(v.dtype), v,
                preferred_element_type=jnp.float32)
            m_sc[...] = m_new

        if is_causal:
            # Skip kv tiles that lie entirely in the masked (future) region.
            @pl.when(kv * TK <= (qi + 1) * TQ - 1)
            def _():
                compute()
        else:
            compute()

        @pl.when(kv == pl.num_programs(2) - 1)
        def _():
            # Dropout (eval mode) = identity.  Exact reciprocal (once per q
            # tile) keeps f32 parity with the reference.
            o_ref[...] = (acc_sc[...] / l_sc[...]).astype(o_ref.dtype)

    return kernel


def base_attention(q, k, v, mask=None, *, causal=None,
                   block_q: int = 256, block_k: int = 256):
    """q, k, v: [B, H, S, D]; mask: broadcastable to [B, H, S, S] (1 = disallowed)."""
    B, H, S, D = q.shape
    BH = B * H

    # ---- mask handling: "none" | "causal" (in-kernel iota) | "bias" (streamed)
    if causal is True:
        mode, m4 = "causal", None
    elif mask is None:
        mode, m4 = "none", None
    else:
        m4 = jnp.asarray(mask)
        while m4.ndim < 4:
            m4 = m4[None]
        mode = "causal" if (causal is None and _is_strict_causal(m4, S)) else "bias"

    # ---- tile selection (multiples of 8 sublane / 128 lane, or full extent)
    TQ = _pick_tile(S, block_q, (8,))
    TK = _pick_tile(S, block_k, (128,) if mode == "bias" else (128, 8))

    # Prefer G=1 once TQ fills the MXU rows; fold (b,h) slices only for small S,
    # keeping >=2 leading grid steps (2-TC sharding) and a small f32 score panel.
    if TQ >= 256 or BH == 1:
        G = 1
    else:
        G = _largest_divisor_leq(BH, max(1, 256 // TQ))
        if BH >= 2 and BH // G < 2:
            G = _largest_divisor_leq(BH, max(1, BH // 2))
        while G > 1 and G * TQ * TK * 4 > (128 << 10):
            G = _largest_divisor_leq(BH, G - 1)

    qf = q.reshape(BH, S, D)
    kf = k.reshape(BH, S, D)
    vf = v.reshape(BH, S, D)

    grid = (BH // G, S // TQ, S // TK)

    q_spec = pl.BlockSpec((G, TQ, D), lambda g, qi, ki: (g, qi, 0))
    kv_spec = pl.BlockSpec((G, TK, D), lambda g, qi, ki: (g, ki, 0))
    o_spec = pl.BlockSpec((G, TQ, D), lambda g, qi, ki: (g, qi, 0))

    in_specs = [q_spec, kv_spec, kv_spec]
    inputs = [qf, kf, vf]

    bias_block_bytes = 0
    if mode == "bias":
        # Pre-bake bias = mask * -10000 (fuses into the broadcast/astype on the
        # XLA side) and store bf16: halves mask DMA, removes the in-kernel mult.
        # 0/1 masks stay numerically exact (bf16(-10000) still underflows exp).
        bias4 = m4.astype(jnp.float32) * jnp.float32(-10000.0)
        shared = (m4.shape[0] == 1) and (m4.shape[1] == 1)
        if shared:
            bias = jnp.broadcast_to(bias4, (1, 1, S, S)).reshape(1, S, S)
            bias = bias.astype(jnp.bfloat16)
            in_specs.append(pl.BlockSpec((1, TQ, TK), lambda g, qi, ki: (0, qi, ki)))
            bias_block_bytes = TQ * TK * 2
        else:
            bias = jnp.broadcast_to(bias4, (B, H, S, S)).reshape(BH, S, S)
            bias = bias.astype(jnp.bfloat16)
            in_specs.append(pl.BlockSpec((G, TQ, TK), lambda g, qi, ki: (g, qi, ki)))
            bias_block_bytes = G * TQ * TK * 2
        inputs.append(bias)

    scratch_shapes = [
        pltpu.VMEM((G, TQ, 1), jnp.float32),   # running max  m
        pltpu.VMEM((G, TQ, 1), jnp.float32),   # running sum  l
        pltpu.VMEM((G, TQ, D), jnp.float32),   # output accumulator
        pltpu.VMEM((G, TQ, D), q.dtype),       # pre-scaled q (hoisted)
    ]

    # VMEM budget from the chosen tiles; cap at ~75% of this generation's VMEM.
    itemsize = jnp.dtype(q.dtype).itemsize
    blk_q = G * TQ * D * itemsize
    blk_kv = G * TK * D * itemsize
    blk_o = G * TQ * D * itemsize
    scratch_bytes = G * TQ * (8 + 4 * D + D * itemsize)
    score_bytes = 2 * G * TQ * TK * 4
    vmem_bytes = (2 * (blk_q + 2 * blk_kv + bias_block_bytes)
                  + 2 * blk_o + scratch_bytes + score_bytes)
    try:
        vmem_cap = int(0.75 * pltpu.get_tpu_info().vmem_capacity_bytes)
    except Exception:
        vmem_cap = 48 << 20
    vmem_limit = int(min(max(2 * vmem_bytes + (2 << 20), 16 << 20), vmem_cap))

    kernel = _make_kernel(mode, 1.0 / math.sqrt(D), TQ, TK)

    out = pl.pallas_call(
        kernel,
        out_shape=jax.ShapeDtypeStruct((BH, S, D), q.dtype),
        grid_spec=pltpu.PrefetchScalarGridSpec(
            num_scalar_prefetch=0,
            grid=grid,
            in_specs=in_specs,
            out_specs=o_spec,
            scratch_shapes=scratch_shapes,
        ),
        compiler_params=pltpu.CompilerParams(
            dimension_semantics=("parallel", "parallel", "arbitrary"),
            vmem_limit_bytes=vmem_limit,
        ),
    )(*inputs)

    return out.reshape(B, H, S, D)


def _reference(q, k, v, mask=None):
    d = k.shape[-1]
    x = jnp.einsum("bhqd,bhkd->bhqk", q, k) / math.sqrt(d)
    if mask is not None:
        x = x + jnp.asarray(mask).astype(x.dtype) * (-10000.0)
    x = jax.nn.softmax(x, axis=-1)
    return jnp.einsum("bhqk,bhkd->bhqd", x, v)


if __name__ == "__main__":
    key = jax.random.PRNGKey(0)
    kq, kk, kv_, km = jax.random.split(key, 4)

    B, H, S, D = 2, 4, 8, 32
    q = jax.random.normal(kq, (B, H, S, D), dtype=jnp.float32)
    k = jax.random.normal(kk, (B, H, S, D), dtype=jnp.float32)
    v = jax.random.normal(kv_, (B, H, S, D), dtype=jnp.float32)

    # Tolerance covers TPU default (reduced-precision) MXU passes for f32
    # matmuls in the XLA reference; interpret mode is exact f32 and far tighter.
    TOL = dict(atol=2e-2, rtol=2e-2)

    # Causal mask (1 where attention is disallowed): auto-detected -> in-kernel
    # iota masking + causal block skipping, nothing streamed from HBM.
    causal_mask = (1.0 - jnp.tril(jnp.ones((S, S), dtype=jnp.float32)))[None, None]
    out = base_attention(q, k, v, causal_mask)
    jax.block_until_ready(out)
    assert out.shape == (B, H, S, D)
    assert jnp.allclose(out, _reference(q, k, v, causal_mask), **TOL), \
        "mismatch vs reference (causal mask)"

    # Arbitrary per-(b,h) 0/1 mask: exercises the streamed bf16-bias path.
    rand_mask = (jax.random.uniform(km, (B, H, S, S)) < 0.25).astype(jnp.float32)
    out_b = base_attention(q, k, v, rand_mask)
    jax.block_until_ready(out_b)
    assert jnp.allclose(out_b, _reference(q, k, v, rand_mask), **TOL), \
        "mismatch vs reference (streamed mask)"

    # No mask.
    out_n = base_attention(q, k, v, None)
    jax.block_until_ready(out_n)
    assert jnp.allclose(out_n, _reference(q, k, v, None), **TOL), \
        "mismatch vs reference (no mask)"

    print("KERNEL_OK")
</pallas_src>

<mosaic_0001>
module attributes {stable_mosaic.version = 11 : i64} {
  func.func @kernel(%arg0: i32, %arg1: i32, %arg2: i32, %arg3: memref<4x8x32xf32, #tpu.memory_space<vmem>>, %arg4: memref<4x8x32xf32, #tpu.memory_space<vmem>>, %arg5: memref<4x8x32xf32, #tpu.memory_space<vmem>>, %arg6: memref<4x8x32xf32, #tpu.memory_space<vmem>>, %arg7: memref<4x8x1xf32, #tpu.memory_space<vmem>>, %arg8: memref<4x8x1xf32, #tpu.memory_space<vmem>>, %arg9: memref<4x8x32xf32, #tpu.memory_space<vmem>>, %arg10: memref<4x8x32xf32, #tpu.memory_space<vmem>>) attributes {dimension_semantics = [#tpu.dimension_semantics<parallel>, #tpu.dimension_semantics<parallel>, #tpu.dimension_semantics<arbitrary>], iteration_bounds = array<i64: 2, 1, 1>, scalar_prefetch = 0 : i64, scratch_operands = 4 : i64, tpu.core_type = #tpu.core_type<tc>, window_params = [{transform_indices = @transform_0, window_bounds = array<i64: 4, 8, 32>}, {transform_indices = @transform_1, window_bounds = array<i64: 4, 8, 32>}, {transform_indices = @transform_2, window_bounds = array<i64: 4, 8, 32>}, {transform_indices = @transform_3, window_bounds = array<i64: 4, 8, 32>}]} {
    %c0_i32 = arith.constant 0 : i32
    %0 = arith.cmpi eq, %arg2, %c0_i32 : i32
    %1 = arith.extui %0 : i1 to i32
    %c0_i32_0 = arith.constant 0 : i32
    %2 = arith.cmpi ne, %1, %c0_i32_0 : i32
    scf.if %2 {
      %cst = arith.constant 0xFF800000 : f32
      %13 = vector.broadcast %cst : f32 to vector<4x8x1xf32>
      %c0 = arith.constant 0 : index
      %c0_6 = arith.constant 0 : index
      %c0_7 = arith.constant 0 : index
      %14 = vector.load %arg7[%c0, %c0_6, %c0_7] : memref<4x8x1xf32, #tpu.memory_space<vmem>>, vector<4x8x1xf32>
      tpu.vector_store %arg7[%c0, %c0_6, %c0_7], %13 {strides = array<i32>} : memref<4x8x1xf32, #tpu.memory_space<vmem>>, vector<4x8x1xf32>,
      %cst_8 = arith.constant 0.000000e+00 : f32
      %15 = vector.broadcast %cst_8 : f32 to vector<4x8x1xf32>
      %c0_9 = arith.constant 0 : index
      %c0_10 = arith.constant 0 : index
      %c0_11 = arith.constant 0 : index
      %16 = vector.load %arg8[%c0_9, %c0_10, %c0_11] : memref<4x8x1xf32, #tpu.memory_space<vmem>>, vector<4x8x1xf32>
      tpu.vector_store %arg8[%c0_9, %c0_10, %c0_11], %15 {strides = array<i32>} : memref<4x8x1xf32, #tpu.memory_space<vmem>>, vector<4x8x1xf32>,
      %cst_12 = arith.constant 0.000000e+00 : f32
      %17 = vector.broadcast %cst_12 : f32 to vector<4x8x32xf32>
      %c0_13 = arith.constant 0 : index
      %c0_14 = arith.constant 0 : index
      %c0_15 = arith.constant 0 : index
      %18 = vector.load %arg9[%c0_13, %c0_14, %c0_15] : memref<4x8x32xf32, #tpu.memory_space<vmem>>, vector<4x8x32xf32>
      tpu.vector_store %arg9[%c0_13, %c0_14, %c0_15], %17 {strides = array<i32>} : memref<4x8x32xf32, #tpu.memory_space<vmem>>, vector<4x8x32xf32>,
      %c0_16 = arith.constant 0 : index
      %c0_17 = arith.constant 0 : index
      %c0_18 = arith.constant 0 : index
      %19 = vector.load %arg3[%c0_16, %c0_17, %c0_18] : memref<4x8x32xf32, #tpu.memory_space<vmem>>, vector<4x8x32xf32>
      %cst_19 = arith.constant 0.176776692 : f32
      %20 = vector.broadcast %cst_19 : f32 to vector<4x8x32xf32>
      %21 = arith.mulf %19, %20 : vector<4x8x32xf32>
      %c0_20 = arith.constant 0 : index
      %c0_21 = arith.constant 0 : index
      %c0_22 = arith.constant 0 : index
      %22 = vector.load %arg10[%c0_20, %c0_21, %c0_22] : memref<4x8x32xf32, #tpu.memory_space<vmem>>, vector<4x8x32xf32>
      tpu.vector_store %arg10[%c0_20, %c0_21, %c0_22], %21 {strides = array<i32>} : memref<4x8x32xf32, #tpu.memory_space<vmem>>, vector<4x8x32xf32>,
    } else {
    }
    %c8_i32 = arith.constant 8 : i32
    %3 = arith.muli %arg2, %c8_i32 : i32
    %c1_i32 = arith.constant 1 : i32
    %4 = arith.addi %arg1, %c1_i32 : i32
    %c8_i32_1 = arith.constant 8 : i32
    %5 = arith.muli %4, %c8_i32_1 : i32
    %c1_i32_2 = arith.constant 1 : i32
    %6 = arith.subi %5, %c1_i32_2 : i32
    %7 = arith.cmpi sle, %3, %6 : i32
    %8 = arith.extui %7 : i1 to i32
    %c0_i32_3 = arith.constant 0 : i32
    %9 = arith.cmpi ne, %8, %c0_i32_3 : i32
    scf.if %9 {
      %c0 = arith.constant 0 : index
      %c0_6 = arith.constant 0 : index
      %c0_7 = arith.constant 0 : index
      %13 = vector.load %arg10[%c0, %c0_6, %c0_7] : memref<4x8x32xf32, #tpu.memory_space<vmem>>, vector<4x8x32xf32>
      %c0_8 = arith.constant 0 : index
      %c0_9 = arith.constant 0 : index
      %c0_10 = arith.constant 0 : index
      %14 = vector.load %arg4[%c0_8, %c0_9, %c0_10] : memref<4x8x32xf32, #tpu.memory_space<vmem>>, vector<4x8x32xf32>
      %c0_11 = arith.constant 0 : index
      %c0_12 = arith.constant 0 : index
      %c0_13 = arith.constant 0 : index
      %15 = vector.load %arg5[%c0_11, %c0_12, %c0_13] : memref<4x8x32xf32, #tpu.memory_space<vmem>>, vector<4x8x32xf32>
      "tpu.trace_start"() <{level = 10 : i32, message = "gqd,gkd->gqk"}> : () -> ()
      %cst = arith.constant dense<0.000000e+00> : vector<4x8x8xf32>
      %16 = tpu.matmul %13, %14, %cst {dimension_numbers = #tpu.dot_dimension_numbers<[2], [2], [1], [1], [0, 0, 0, 1, 1, 1], [0], [0]>} : vector<4x8x32xf32>, vector<4x8x32xf32>, vector<4x8x8xf32> -> vector<4x8x8xf32>
      "tpu.trace_stop"() : () -> ()
      %17 = tpu.iota {dimensions = array<i32: 0>} : vector<8x8xi32>
      %c8_i32_14 = arith.constant 8 : i32
      %18 = arith.muli %arg1, %c8_i32_14 : i32
      %19 = vector.broadcast %18 : i32 to vector<8x8xi32>
      %20 = arith.addi %17, %19 : vector<8x8xi32>
      %21 = tpu.iota {dimensions = array<i32: 1>} : vector<8x8xi32>
      %c8_i32_15 = arith.constant 8 : i32
      %22 = arith.muli %arg2, %c8_i32_15 : i32
      %23 = vector.broadcast %22 : i32 to vector<8x8xi32>
      %24 = arith.addi %21, %23 : vector<8x8xi32>
      %25 = arith.cmpi sgt, %24, %20 : vector<8x8xi32>
      %cst_16 = arith.constant -1.000000e+04 : f32
      %cst_17 = arith.constant 0.000000e+00 : f32
      %26 = vector.broadcast %cst_16 : f32 to vector<8x8xf32>
      %27 = vector.broadcast %cst_17 : f32 to vector<8x8xf32>
      %28 = arith.select %25, %26, %27 : vector<8x8xi1>, vector<8x8xf32>
      %29 = vector.shape_cast %28 : vector<8x8xf32> to vector<1x8x8xf32>
      %30 = vector.broadcast %29 : vector<1x8x8xf32> to vector<4x8x8xf32>
      %31 = arith.addf %16, %30 : vector<4x8x8xf32>
      %c0_18 = arith.constant 0 : index
      %c0_19 = arith.constant 0 : index
      %c0_20 = arith.constant 0 : index
      %32 = vector.load %arg7[%c0_18, %c0_19, %c0_20] : memref<4x8x1xf32, #tpu.memory_space<vmem>>, vector<4x8x1xf32>
      %cst_21 = arith.constant dense<0xFF800000> : vector<4x8xf32>
      %33 = vector.multi_reduction <maximumf>, %31, %cst_21 [2] : vector<4x8x8xf32> to vector<4x8xf32>
      %34 = vector.shape_cast %33 : vector<4x8xf32> to vector<4x8x1xf32>
      %35 = arith.maximumf %32, %34 : vector<4x8x1xf32>
      %36 = arith.subf %32, %35 : vector<4x8x1xf32>
      %37 = math.exp %36 : vector<4x8x1xf32>
      %38 = vector.broadcast %35 : vector<4x8x1xf32> to vector<4x8x8xf32>
      %39 = arith.subf %31, %38 : vector<4x8x8xf32>
      %40 = math.exp %39 : vector<4x8x8xf32>
      %c0_22 = arith.constant 0 : index
      %c0_23 = arith.constant 0 : index
      %c0_24 = arith.constant 0 : index
      %41 = vector.load %arg8[%c0_22, %c0_23, %c0_24] : memref<4x8x1xf32, #tpu.memory_space<vmem>>, vector<4x8x1xf32>
      %42 = arith.mulf %37, %41 : vector<4x8x1xf32>
      %cst_25 = arith.constant dense<0.000000e+00> : vector<4x8xf32>
      %43 = vector.multi_reduction <add>, %40, %cst_25 [2] : vector<4x8x8xf32> to vector<4x8xf32>
      %44 = vector.shape_cast %43 : vector<4x8xf32> to vector<4x8x1xf32>
      %45 = arith.addf %42, %44 : vector<4x8x1xf32>
      %c0_26 = arith.constant 0 : index
      %c0_27 = arith.constant 0 : index
      %c0_28 = arith.constant 0 : index
      %46 = vector.load %arg8[%c0_26, %c0_27, %c0_28] : memref<4x8x1xf32, #tpu.memory_space<vmem>>, vector<4x8x1xf32>
      tpu.vector_store %arg8[%c0_26, %c0_27, %c0_28], %45 {strides = array<i32>} : memref<4x8x1xf32, #tpu.memory_space<vmem>>, vector<4x8x1xf32>,
      %c0_29 = arith.constant 0 : index
      %c0_30 = arith.constant 0 : index
      %c0_31 = arith.constant 0 : index
      %47 = vector.load %arg9[%c0_29, %c0_30, %c0_31] : memref<4x8x32xf32, #tpu.memory_space<vmem>>, vector<4x8x32xf32>
      %48 = vector.broadcast %37 : vector<4x8x1xf32> to vector<4x8x32xf32>
      %49 = arith.mulf %48, %47 : vector<4x8x32xf32>
      "tpu.trace_start"() <{level = 10 : i32, message = "gqk,gkd->gqd"}> : () -> ()
      %cst_32 = arith.constant dense<0.000000e+00> : vector<4x8x32xf32>
      %50 = tpu.matmul %40, %15, %cst_32 {dimension_numbers = #tpu.dot_dimension_numbers<[2], [1], [1], [2], [0, 0, 0, 1, 1, 2], [0], [0]>} : vector<4x8x8xf32>, vector<4x8x32xf32>, vector<4x8x32xf32> -> vector<4x8x32xf32>
      "tpu.trace_stop"() : () -> ()
      %51 = arith.addf %49, %50 : vector<4x8x32xf32>
      %c0_33 = arith.constant 0 : index
      %c0_34 = arith.constant 0 : index
      %c0_35 = arith.constant 0 : index
      %52 = vector.load %arg9[%c0_33, %c0_34, %c0_35] : memref<4x8x32xf32, #tpu.memory_space<vmem>>, vector<4x8x32xf32>
      tpu.vector_store %arg9[%c0_33, %c0_34, %c0_35], %51 {strides = array<i32>} : memref<4x8x32xf32, #tpu.memory_space<vmem>>, vector<4x8x32xf32>,
      %c0_36 = arith.constant 0 : index
      %c0_37 = arith.constant 0 : index
      %c0_38 = arith.constant 0 : index
      %53 = vector.load %arg7[%c0_36, %c0_37, %c0_38] : memref<4x8x1xf32, #tpu.memory_space<vmem>>, vector<4x8x1xf32>
      tpu.vector_store %arg7[%c0_36, %c0_37, %c0_38], %35 {strides = array<i32>} : memref<4x8x1xf32, #tpu.memory_space<vmem>>, vector<4x8x1xf32>,
    } else {
    }
    %c0_i32_4 = arith.constant 0 : i32
    %10 = arith.cmpi eq, %arg2, %c0_i32_4 : i32
    %11 = arith.extui %10 : i1 to i32
    %c0_i32_5 = arith.constant 0 : i32
    %12 = arith.cmpi ne, %11, %c0_i32_5 : i32
    scf.if %12 {
      %c0 = arith.constant 0 : index
      %c0_6 = arith.constant 0 : index
      %c0_7 = arith.constant 0 : index
      %13 = vector.load %arg9[%c0, %c0_6, %c0_7] : memref<4x8x32xf32, #tpu.memory_space<vmem>>, vector<4x8x32xf32>
      %c0_8 = arith.constant 0 : index
      %c0_9 = arith.constant 0 : index
      %c0_10 = arith.constant 0 : index
      %14 = vector.load %arg8[%c0_8, %c0_9, %c0_10] : memref<4x8x1xf32, #tpu.memory_space<vmem>>, vector<4x8x1xf32>
      %15 = vector.broadcast %14 : vector<4x8x1xf32> to vector<4x8x32xf32>
      %16 = arith.divf %13, %15 : vector<4x8x32xf32>
      %c0_11 = arith.constant 0 : index
      %c0_12 = arith.constant 0 : index
      %c0_13 = arith.constant 0 : index
      %17 = vector.load %arg6[%c0_11, %c0_12, %c0_13] : memref<4x8x32xf32, #tpu.memory_space<vmem>>, vector<4x8x32xf32>
      tpu.vector_store %arg6[%c0_11, %c0_12, %c0_13], %16 {strides = array<i32>} : memref<4x8x32xf32, #tpu.memory_space<vmem>>, vector<4x8x32xf32>,
    } else {
    }
    return
  }
  func.func @transform_0(%arg0: i32, %arg1: i32, %arg2: i32) -> (i32, i32, i32) {
    %c0_i32 = arith.constant 0 : i32
    %c0_i32_0 = arith.constant 0 : i32
    return %arg0, %arg1, %c0_i32 : i32, i32, i32
  }
  func.func @transform_1(%arg0: i32, %arg1: i32, %arg2: i32) -> (i32, i32, i32) {
    %c0_i32 = arith.constant 0 : i32
    %c0_i32_0 = arith.constant 0 : i32
    return %arg0, %arg2, %c0_i32 : i32, i32, i32
  }
  func.func @transform_2(%arg0: i32, %arg1: i32, %arg2: i32) -> (i32, i32, i32) {
    %c0_i32 = arith.constant 0 : i32
    %c0_i32_0 = arith.constant 0 : i32
    return %arg0, %arg2, %c0_i32 : i32, i32, i32
  }
  func.func @transform_3(%arg0: i32, %arg1: i32, %arg2: i32) -> (i32, i32, i32) {
    %c0_i32 = arith.constant 0 : i32
    %c0_i32_0 = arith.constant 0 : i32
    return %arg0, %arg1, %c0_i32 : i32, i32, i32
  }
}

</mosaic_0001>

<bundles_post_ra>
// kernel: tpu_custom_call.1
= control target key start
LH: loop header
LB: loop body
LE: loop exit
PB: predicated region body
PF: predicated region fallthrough
CT: control target
= control target key end

     0   :  { %s2102_s0 = inlined_call_operand.hbm [shape: f32[8,8,32], index: 0, kind: input, shape index: {}]   ;;  %s2103_s1 = inlined_call_operand.hbm [shape: f32[8,8,32], index: 1, kind: input, shape index: {}]   ;;  %s2104_s2 = inlined_call_operand.hbm [shape: f32[8,8,32], index: 2, kind: input, shape index: {}]   ;;  %s2105_s3 = inlined_call_operand.hbm [shape: f32[8,8,32], index: 3, kind: output, shape index: {}]  }
   0x1   :  { %2115 = sst [smem:[#allocation19_spill]] %s2103_s1 }
   0x2   :  { %8 = vsyncpa [#allocation7], 0 }
   0x3   :  { %10 = vsyncpa [#allocation7 + $0x1], 0 }
   0x4   :  { %11 = vsyncpa [#allocation10], 0 }
   0x5   :  { %13 = vsyncpa [#allocation10 + $0x1], 0 }
   0x6   :  { %14 = vsyncpa [#allocation8], 0 }
   0x7   :  { %16 = vsyncpa [#allocation8 + $0x1], 0  ;;  %s1697_s12 = smov 0   ;;  %s1699_s13 = smov 0  }
   0x8   :  { %s1701_s14 = smov 0   ;;  %s1703_s15 = smov 0  }
   0x9   :  { %s1705_s16 = smov 0   ;;  %s1707_s17 = smov 0  }
   0xa LB: > { %2116 = sst [smem:[#allocation16_spill]] %s1659_s16  ;;  %s1728_s18 = sadd.s32 4294967295, %s1663_s17   ;;  %s1663_s17 = sphi %s1707_s17, %s22_s17   ;;  %s1659_s16 = sphi %s1705_s16, %s2139_s16   ;;  %s1655_s15 = sphi %s1703_s15, %s2138_s15   ;;  %s1651_s14 = sphi %s1701_s14, %s2142_s14   ;;  %s1647_s13 = sphi %s1699_s13, %s2141_s13   ;;  %s1643_s12 = sphi %s1697_s12, %s2140_s12  }
   0xb   : > { %s1287_s19 = sadd.s32 4294967294, %s1663_s17   ;;  %s41_s20 = sadd.s32 1, %s1659_s16 }
   0xc   : > { %s50_s21 = sadd.s32 1, %s1651_s14  ;;  %p43_p0 = scmp.ge.s32.totalorder %s41_s20, 2 }
   0xd   : > { %p57_p1 = scmp.ne.s32.totalorder %s1651_s14, %s1647_s13  ;;  %p58_p2 = scmp.eq.s32.totalorder %s1663_s17, 0 }
   0xe   : > { %p63_p3 = scmp.ne.s32.totalorder %s1647_s13, %s1643_s12  ;;  %s2144_s20 = smov (%p43_p0, %s41_s20), 0 }
   0xf   : > { %2117 = sst [smem:[#allocation17_spill]] %s2144_s20  ;;  %p1740_p4 = por %p58_p2, %p57_p1 }
  0x10   : > { %p64_p5 = scmp.eq.s32.totalorder %s1728_s18, 0  ;;  %s45_s23 = ssub.s32 %s1659_s16, %s2144_s20 }
  0x11   : > { %p145_p6 = scmp.eq.s32.totalorder %s1728_s18, 1  ;;  %p48_p7 = scmp.eq.s32.totalorder %s45_s23, 0 }
  0x12   : > { %p1748_p8 = por %p64_p5, %p63_p3  ;;  %p151_p10 = scmp.eq.s32.totalorder %s1287_s19, 1 }
  0x13   : > { %p1752_p9 = por %p145_p6, %p57_p1  ;;  %p1403_p13 = scmp.lt.s32.totalorder %s1663_s17, 2 }
  0x14   : > { %s2119_s24 = scalar_select %p1748_p8, 1, 0 }
  0x15   : > { %s2120_s25 = scalar_select %p1752_p9, 1, 0 }
  0x16   : > { %s1757_s26 = scalar_select %p48_p7, %s1651_s14, %s50_s21  }
  0x17   : > { %p1759_p11 = por %p151_p10, %p63_p3  ;;  %s2108_s28 = sand.u32 1, %s1651_s14  }
  0x18   : > { %2121 = sst [smem:[#allocation18_spill]] %s1757_s26  ;;  %s1768_s29 = sshll.u32 %s2108_s28, 5 }
  0x19   : > { %s2122_s27 = scalar_select %p1759_p11, 1, 0 }
  0x1a   : > { %s1771_s30 = sshll.u32 %s1659_s16, 9  ;;  %p1775_p0 = pnand %p1403_p13, %p1740_p4 }
  0x1b   : > { %s193_s5 = sand.u32 1, %s1663_s17   ;;  %s2124_s1 = sld [smem:[#allocation19_spill]] }
  0x1c   : > { %s197_s9 = scalar_lea.vmem [#allocation9], %s1768_s29  ;;  %s1791_s11 = scalar_lea.sflag [#allocation10], %s193_s5 }
  0x1d   : > { %s205_s10 = sshll.u32 %s197_s9, 4  ;;  %p1797_p4 = pneg %p1775_p0  ;;  %s1788_s10 = int_to_ptr.vmem [resolvable:$true] %s205_s10 }
  0x21   : > { %s1784_s8 = scalar_lea.hbm %s2124_s1, %s1771_s30  ;;  %s1492_s6 = scalar_lea.hbm %s2124_s1, 1024 }
  0x22   : > { %s1487_s19 = scalar_lea.hbm %s1784_s8, 512  ;;  %p1493_p7 = scmp.lt.u32.totalorder %s1784_s8, %s2124_s1 }
  0x23   : > { %p1488_p3 = scmp.ne.s32.totalorder %s1784_s8, %s1487_s19  ;;  %p1494_p10 = scmp.lt.u32.totalorder %s1492_s6, %s1487_s19 }
  0x24   : > { %p1496_p12 = scmp.lt.u32.totalorder %s1487_s19, %s1784_s8 }
  0x25   : > { %p1490_p5 = pnand %p1797_p4, %p1488_p3  ;;  %p1495_p13 = por %p1494_p10, %p1493_p7 }
  0x27   : > { %p1491_p6 = pneg %p1490_p5  ;;  %p1497_p1 = por %p1496_p12, %p1495_p13 }
  0x29   : > { %p1498_p2 = pnand %p1497_p1, %p1491_p6 }
  0x2b   : > { %1501 = shalt.err (!%p1498_p2)
}
  0x2c   : > { %s1502_s5 = scalar_lea.vmem %s1788_s10, 512  ;;  %s1665_s22 = smov [#allocation9]  }
  0x2d   : > { %p1503_p3 = scmp.ne.s32.totalorder %s1788_s10, %s1502_s5  ;;  %s1507_s23 = sshll.u32 %s1665_s22, 4  ;;  %s1508_s23 = int_to_ptr.vmem [resolvable:$false] %s1507_s23 }
  0x2e   : > { %s1509_s7 = scalar_lea.vmem %s1508_s23, 1024  ;;  %p1510_p9 = scmp.lt.s32.totalorder %s1788_s10, %s1508_s23 }
  0x2f   : > { %p1505_p5 = pnand %p1503_p3, %p1797_p4  ;;  %p1511_p8 = scmp.lt.s32.totalorder %s1509_s7, %s1502_s5 }
  0x31   : > { %p1506_p11 = pneg %p1505_p5  ;;  %p1512_p7 = por %p1511_p8, %p1510_p9 }
  0x33   : > { %p1513_p10 = pnand %p1512_p7, %p1506_p11 }
  0x35   : > { %1516 = shalt.err (!%p1513_p10)
}
  0x36   : > { %s2109_s19 = smov 128   ;;  %s2111_s6 = smov 8  }
  0x37   : > { %1395 = dma.hbm_to_vmem [thread:$0]  (!%p1775_p0), %s1784_s8, 512, %s1788_s10, %s1791_s11, %s2109_s19, %s2109_s19, %s2111_s6  }
  0x38   : > { %p2126_p8 = scmp.lt.s32.totalorder %s1663_s17, 3  ;;  %p2127_p9 = scmp.ge.s32.totalorder %s1663_s17, 1 }
  0x39   : > { %s1836_s23 = scalar_lea.hbm %s2102_s0, %s1771_s30  ;;  %s175_s7 = scalar_lea.vmem [#allocation6], %s1768_s29 }
  0x3a   : > { %p1828_p11 = pnand %p2127_p9, %p2126_p8  ;;  %s183_s28 = sshll.u32 %s175_s7, 4  ;;  %s1839_s28 = int_to_ptr.vmem [resolvable:$true] %s183_s28 }
  0x3b   : > { %s1845_s19 = scalar_lea.hbm %s2104_s2, %s1771_s30  ;;  %s2129_s6 = sand.u32 1, %s1651_s14  }
  0x3c   : > { %s2128_s9 = scalar_select %p1828_p11, 1, 0 }
  0x3d   : > { %s1849_s1 = scalar_lea.sflag [#allocation7], %s2129_s6  ;;  %s1517_s20 = scalar_lea.hbm %s1836_s23, 512 }
  0x3e   : > { %p1518_p12 = scmp.ne.s32.totalorder %s1836_s23, %s1517_s20  ;;  %s1522_s16 = scalar_lea.hbm %s2102_s0, 1024 }
  0x3f   : > { %p1523_p6 = scmp.lt.u32.totalorder %s1836_s23, %s2102_s0  ;;  %p1524_p13 = scmp.lt.u32.totalorder %s1522_s16, %s1517_s20 }
  0x40   : > { %p1520_p1 = pnand %p1518_p12, %p1797_p4  ;;  %p1526_p5 = scmp.lt.u32.totalorder %s1517_s20, %s1836_s23 }
  0x41   : > { %p1525_p3 = por %p1524_p13, %p1523_p6 }
  0x42   : > { %p1521_p2 = pneg %p1520_p1 }
  0x43   : > { %p1527_p7 = por %p1526_p5, %p1525_p3 }
  0x45   : > { %p1528_p10 = pnand %p1527_p7, %p1521_p2 }
  0x47   : > { %1531 = shalt.err (!%p1528_p10)
}
  0x48   : > { %s1532_s30 = scalar_lea.vmem %s1839_s28, 512  ;;  %s1668_s6 = smov [#allocation6]  }
  0x49   : > { %p1533_p8 = scmp.ne.s32.totalorder %s1839_s28, %s1532_s30  ;;  %s1537_s8 = sshll.u32 %s1668_s6, 4  ;;  %s1538_s8 = int_to_ptr.vmem [resolvable:$false] %s1537_s8 }
  0x4a   : > { %s1539_s26 = scalar_lea.vmem %s1538_s8, 1024  ;;  %p1540_p1 = scmp.lt.s32.totalorder %s1839_s28, %s1538_s8 }
  0x4b   : > { %p1535_p9 = pnand %p1533_p8, %p1797_p4  ;;  %p1541_p11 = scmp.lt.s32.totalorder %s1539_s26, %s1532_s30 }
  0x4d   : > { %p1536_p12 = pneg %p1535_p9  ;;  %p1542_p6 = por %p1541_p11, %p1540_p1 }
  0x4f   : > { %p1543_p13 = pnand %p1542_p6, %p1536_p12 }
  0x51   : > { %1546 = shalt.err (!%p1543_p13)
}
  0x52   : > { %s2130_s16 = smov 8   ;;  %s2131_s20 = smov 128  }
  0x53   : > { %1392 = dma.hbm_to_vmem [thread:$0]  (!%p1775_p0), %s1836_s23, 512, %s1839_s28, %s1849_s1, %s2131_s20, %s2131_s20, %s2130_s16  }
  0x54   : > { %s219_s10 = scalar_lea.vmem [#allocation11], %s1768_s29  ;;  %s1547_s22 = scalar_lea.hbm %s1845_s19, 512 }
  0x55   : > { %s227_s5 = sshll.u32 %s219_s10, 4  ;;  %p1548_p11 = scmp.ne.s32.totalorder %s1845_s19, %s1547_s22  ;;  %s1877_s5 = int_to_ptr.vmem [resolvable:$true] %s227_s5 }
  0x56   : > { %s1552_s6 = scalar_lea.hbm %s2104_s2, 1024  ;;  %p1553_p5 = scmp.lt.u32.totalorder %s1845_s19, %s2104_s2 }
  0x57   : > { %p1550_p2 = pnand %p1548_p11, %p1797_p4  ;;  %p1554_p7 = scmp.lt.u32.totalorder %s1552_s6, %s1547_s22 }
  0x58   : > { %p1556_p8 = scmp.lt.u32.totalorder %s1547_s22, %s1845_s19 }
  0x59   : > { %p1551_p3 = pneg %p1550_p2  ;;  %p1555_p10 = por %p1554_p7, %p1553_p5 }
  0x5b   : > { %p1557_p9 = por %p1556_p8, %p1555_p10 }
  0x5d   : > { %p1558_p12 = pnand %p1557_p9, %p1551_p3 }
  0x5f   : > { %1561 = shalt.err (!%p1558_p12)
}
  0x60   : > { %s1562_s1 = scalar_lea.vmem %s1877_s5, 512  ;;  %s1669_s28 = smov [#allocation11]  }
  0x61   : > { %p1563_p1 = scmp.ne.s32.totalorder %s1877_s5, %s1562_s1  ;;  %s1567_s29 = sshll.u32 %s1669_s28, 4  ;;  %s1568_s29 = int_to_ptr.vmem [resolvable:$false] %s1567_s29 }
  0x62   : > { %s1569_s23 = scalar_lea.vmem %s1568_s29, 1024  ;;  %p1570_p11 = scmp.lt.s32.totalorder %s1877_s5, %s1568_s29 }
  0x63   : > { %p1565_p6 = pnand %p1563_p1, %p1797_p4  ;;  %p1571_p2 = scmp.lt.s32.totalorder %s1569_s23, %s1562_s1 }
  0x65   : > { %p1566_p13 = pneg %p1565_p6  ;;  %p1572_p5 = por %p1571_p2, %p1570_p11 }
  0x67   : > { %p1573_p7 = pnand %p1572_p5, %p1566_p13 }
  0x69   : > { %1576 = shalt.err (!%p1573_p7)
}
  0x6a   : > { %1398 = dma.hbm_to_vmem [thread:$0]  (!%p1775_p0), %s1845_s19, 512, %s1877_s5, %s1791_s11, %s2131_s20, %s2131_s20, %s2130_s16  }
  0x6b   : > { %p2132_p4 = scmp.ne.s32.totalorder %s2128_s9, 0 }
  0x6c   : > { %s1907_s21 = sand.u32 (!%p2132_p4), 1, %s1647_s13   ;;  %p2133_p3 = scmp.ne.s32.totalorder (!%p2132_p4), %s2119_s24, 0 }
  0x6d   : > { %239 = sbr.rel (%p2132_p4) target bundleno = 955 (0x3bb), region = 32  ;;  %s1910_s10 = sshll.u32 (!%p2132_p4), %s1907_s21, 5 }
  0x6e   : > { %s242_s4 = scalar_lea.sflag (!%p2132_p4), [#allocation7], %s1907_s21  ;;  %s1914_s22 = scalar_lea.vmem (!%p2132_p4), [#allocation6], %s1910_s10 }
  0x74   : > { %1630 = dma.done.wait (%p2133_p3), %s242_s4, 512  }
  0x75   : > { %1632 = vsyncadd (%p2133_p3), %s242_s4, 4294966784  ;;  %s250_s11 = sand.u32 1, %s1728_s18   ;;  %s1922_s9 = scalar_lea.vmem [#allocation9], %s1910_s10 }
  0x76   : > { %s251_s19 = scalar_lea.sflag [#allocation10], %s250_s11 }
  0x77   : > { %1634 = dma.done.wait (%p2133_p3), %s251_s19, 1024  }
  0x78   : > { %1636 = vsyncadd (%p2133_p3), %s251_s19, 4294966272  ;;  %vm313_vm0 = vcmask 261120   ;;  %v1670_v0 = vmov 0.0   ;;  %vm1671_vm1 = vmmov 0   ;;  %v342_v1 = vld [vmem:[%s1922_s9] sm:$0xff]  ;;  %v343_v3 = vld [vmem:[%s1922_s9 + $0x8] sm:$0xff]  ;;  %v350_v18 = vlaneseq }
  0x79   : > { %1341 = vmatprep.subr.mxu0 %v1670_v0  ;;  %314 = vst.msk [vmem:[#allocation4] sm:$0xff] %vm313_vm0, %v1670_v0  ;;  %315 = vst.msk [vmem:[#allocation4 + $0x8] sm:$0xff] %vm313_vm0, %v1670_v0  ;;  %1343 = vmatprep.mubr.msk.f32.mxu0 %vm1671_vm1, %v1670_v0  ;;  %v318_v2 = vld [vmem:[%s1914_s22] sm:$0xff]  ;;  %v319_v5 = vld [vmem:[%s1914_s22 + $0x8] sm:$0xff]  ;;  %vm304_vm2 = vcmask 7168   ;;  %v1672_v17 = vmov -inf  }
  0x7a   : > { %316 = vst.msk [vmem:[#allocation4 + $0x10] sm:$0xff] %vm313_vm0, %v1670_v0  ;;  %317 = vst.msk [vmem:[#allocation4 + $0x18] sm:$0xff] %vm313_vm0, %v1670_v0  ;;  %1346 = vmatprep.subr.mxu1 %v1670_v0  ;;  %1348 = vmatprep.mubr.msk.f32.mxu1 %vm1671_vm1, %v1670_v0  ;;  %v322_v4 = vmul.f32 0.17677669, %v318_v2  ;;  %v320_v6 = vld [vmem:[%s1914_s22 + $0x10] sm:$0xff]  ;;  %v321_v9 = vld [vmem:[%s1914_s22 + $0x18] sm:$0xff] }
  0x7b   : > { %1342 = vmatpush3.xpose.msk.msra.mxu0 %vm313_vm0, %v342_v1  ;;  %1347 = vmatpush3.xpose.msk.msra.mxu1 %vm313_vm0, %v343_v3  ;;  %v323_v7 = vmul.f32 0.17677669, %v319_v5  ;;  %v324_v8 = vmul.f32 0.17677669, %v320_v6  ;;  %v325_v10 = vmul.f32 0.17677669, %v321_v9 }
  0x7c   : > { %1351 = vmatprep.subr.mxu0 %v1670_v0  ;;  %1356 = vmatprep.subr.mxu1 %v1670_v0  ;;  %326 = vst.msk [vmem:[#allocation5] sm:$0xff] %vm313_vm0, %v322_v4  ;;  %v344_v11 = vld [vmem:[%s1922_s9 + $0x10] sm:$0xff]  ;;  %v345_v13 = vld [vmem:[%s1922_s9 + $0x18] sm:$0xff]  ;;  %v351_v19 = vshrl.u32 %v350_v18, 7  ;;  %v356_v20 = vand.u32 127, %v350_v18  ;;  %vm670_vm4 = vcmask 64512  }
  0x7d   : > { %327 = vst.msk [vmem:[#allocation5 + $0x8] sm:$0xff] %vm313_vm0, %v323_v7  ;;  %328 = vst.msk [vmem:[#allocation5 + $0x10] sm:$0xff] %vm313_vm0, %v324_v8  ;;  %v1673_v38 = vmov 0   ;;  %s263_s18 = scalar_lea.vmem [#allocation11], %s1910_s10  ;;  %s295_s24 = scalar_lea.vmem [#allocation12], %s1910_s10 }
  0x7e   : > { %329 = vst.msk [vmem:[#allocation5 + $0x18] sm:$0xff] %vm313_vm0, %v325_v10  ;;  %vm359_vm3 = vcmp.gt.s32.totalorder %v356_v20, %v351_v19  ;;  %1461 = vset.pattern.permute.xlu0 %v1673_v38  ;;  %1462 = vset.pattern.permute.xlu1 %v1673_v38  ;;  %v346_v55 = vld [vmem:[%s263_s18] sm:$0xff]  ;;  %v347_v56 = vld [vmem:[%s263_s18 + $0x8] sm:$0xff]  ;;  %v348_v5 = vld [vmem:[%s263_s18 + $0x10] sm:$0xff]  ;;  %s1324_s16 = sshll.u32 %s1655_s15, 9  ;;  %s1151_s20 = sshll.u32 %s295_s24, 4  ;;  %s2052_s20 = int_to_ptr.vmem [resolvable:$true] %s1151_s20 }
  0x7f   : > { %305 = vst.msk [vmem:[#allocation2] sm:$0xff] %vm304_vm2, %v1672_v17  ;;  %306 = vst.msk [vmem:[#allocation2 + $0x8] sm:$0xff] %vm304_vm2, %v1672_v17  ;;  %v360_v21 = vsel %vm359_vm3, -10000.0, %v1670_v0  ;;  %v349_v9 = vld [vmem:[%s263_s18 + $0x18] sm:$0xff]  ;;  %s2050_s30 = scalar_lea.hbm %s2105_s3, %s1324_s16  ;;  %s1137_s6 = scalar_lea.sflag [#allocation8], %s1907_s21 }
  0x80   : > { %307 = vst.msk [vmem:[#allocation2 + $0x10] sm:$0xff] %vm304_vm2, %v1672_v17  ;;  %308 = vst.msk [vmem:[#allocation2 + $0x18] sm:$0xff] %vm304_vm2, %v1672_v17  ;;  %s1577_s15 = scalar_lea.vmem %s2052_s20, 512  ;;  %p2134_p10 = scmp.ne.s32.totalorder %s2120_s25, 0 }
  0x81   : > { %309 = vst.msk [vmem:[#allocation3] sm:$0xff] %vm304_vm2, %v1670_v0  ;;  %310 = vst.msk [vmem:[#allocation3 + $0x8] sm:$0xff] %vm304_vm2, %v1670_v0  ;;  %p1578_p0 = scmp.ne.s32.totalorder %s2052_s20, %s1577_s15  ;;  %s1674_s8 = smov [#allocation12]  }
  0x82   : > { %311 = vst.msk [vmem:[#allocation3 + $0x10] sm:$0xff] %vm304_vm2, %v1670_v0  ;;  %312 = vst.msk [vmem:[#allocation3 + $0x18] sm:$0xff] %vm304_vm2, %v1670_v0  ;;  %s1581_s26 = sshll.u32 %s1674_s8, 4  ;;  %s1582_s26 = int_to_ptr.vmem [resolvable:$false] %s1581_s26 }
  0x83   : > { %v338_v12 = vld [vmem:[#allocation5] sm:$0xff]  ;;  %p1579_p8 = pnand %p1578_p0, %p2134_p10  ;;  %s1583_s1 = scalar_lea.vmem %s1582_s26, 1024 }
  0x84   : > { %1344 = vmatmul.mubr.msk.f32.vlgmr.msra.gmra.mrb[0].mxu0 %vm313_vm0, %v338_v12  ;;  %v339_v14 = vld [vmem:[#allocation5 + $0x8] sm:$0xff]  ;;  %v340_v15 = vld [vmem:[#allocation5 + $0x10] sm:$0xff]  ;;  %p1584_p12 = scmp.lt.s32.totalorder %s2052_s20, %s1582_s26  ;;  %p1585_p1 = scmp.lt.s32.totalorder %s1583_s1, %s1577_s15 }
  0x85   : > { %1349 = vmatmul.mubr.msk.f32.vlgmr.msra.gmra.mrb[0].mxu1 %vm313_vm0, %v339_v14  ;;  %1352 = vmatpush3.xpose.msk.msra.mxu0 %vm313_vm0, %v344_v11  ;;  %v341_v16 = vld [vmem:[#allocation5 + $0x18] sm:$0xff]  ;;  %p1580_p9 = pneg %p1579_p8 }
  0x86   : > { %1353 = vmatprep.mubr.msk.f32.mxu0 %vm1671_vm1, %v1670_v0  ;;  %1357 = vmatpush3.xpose.msk.msra.mxu1 %vm313_vm0, %v345_v13  ;;  %v1991_v39 = vld [vmem:[#allocation2] sm:$0xff]  ;;  %v1996_v42 = vld [vmem:[#allocation2 + $0x8] sm:$0xff]  ;;  %p1586_p6 = por %p1585_p1, %p1584_p12 }
  0x87   : > { %1358 = vmatprep.mubr.msk.f32.mxu1 %vm1671_vm1, %v1670_v0  ;;  %1361 = vmatprep.subr.mxu0 %v1670_v0  ;;  %v1998_v43 = vld [vmem:[#allocation2 + $0x10] sm:$0xff]  ;;  %v2007_v49 = vld [vmem:[#allocation2 + $0x18] sm:$0xff] }
  0x88   : > { %1354 = vmatmul.mubr.msk.f32.vlgmr.msra.gmra.mrb[2].mxu0 %vm313_vm0, %v340_v15  ;;  %1366 = vmatprep.subr.mxu1 %v1670_v0  ;;  %p1587_p13 = pnand %p1586_p6, %p1580_p9 }
  0x89   : > { %1359 = vmatmul.mubr.msk.f32.vlgmr.msra.gmra.mrb[2].mxu1 %vm313_vm0, %v341_v16  ;;  %1363 = vmatprep.mubr.msk.f32.mxu0 %vm1671_vm1, %v1670_v0 }
  0x8a   : > { %1368 = vmatprep.mubr.msk.f32.mxu1 %vm1671_vm1, %v1670_v0  ;;  %1362 = vmatpush3.msra.mxu0 %v346_v55 }
  0x8b   : > { %1371 = vmatprep.subr.mxu0 %v1670_v0  ;;  %1367 = vmatpush3.msra.mxu1 %v347_v56 }
  0x8c   : > { %1376 = vmatprep.subr.mxu1 %v1670_v0 }
 0x157   : > { %v434_v22 = vpop.f32.mrb[0].mxu0 }
 0x158   : > { %v435_v23 = vadd.f32 %v434_v22, %v360_v21  ;;  %v1345_v24 = vpop.f32.mrb[1].mxu0  ;;  %v510_v25 = vpop.f32.mrb[0].mxu1 }
 0x159   : > { %v511_v26 = vadd.f32 %v510_v25, %v360_v21  ;;  %v1350_v27 = vpop.f32.mrb[1].mxu1 }
 0x15a   : > { %v671_v28 = vsel %vm670_vm4, %v435_v23, -inf }
 0x15b   : > { %672 = vmax.xlane.f32.xlu0 %v671_v28  ;;  %v586_v29 = vpop.f32.mrb[2].mxu0  ;;  %v674_v31 = vsel %vm670_vm4, %v511_v26, -inf }
 0x15c   : > { %v587_v30 = vadd.f32 %v586_v29, %v360_v21  ;;  %v1355_v32 = vpop.f32.mrb[3].mxu0  ;;  %v662_v33 = vpop.f32.mrb[2].mxu1 }
 0x15d   : > { %v663_v34 = vadd.f32 %v662_v33, %v360_v21  ;;  %v1360_v35 = vpop.f32.mrb[3].mxu1 }
 0x15e   : > { %v677_v36 = vsel %vm670_vm4, %v587_v30, -inf }
 0x15f   : > { %675 = vmax.xlane.f32.xlu0 %v674_v31  ;;  %678 = vmax.xlane.f32.xlu1 %v677_v36  ;;  %v680_v37 = vsel %vm670_vm4, %v663_v34, -inf }
 0x163   : > { %681 = vmax.xlane.f32.xlu1 %v680_v37 }
 0x1e8   : > { %v673_v40 = vpop.xlane.xlu0 %672 }
 0x1e9   : > { %v1994_v41 = vmax.f32 %v1991_v39, %v673_v40 }
 0x1eb   : > { %v687_v44 = vsub.f32 %v1991_v39, %v1994_v41  ;;  %1088 = vst.msk [vmem:[#allocation2] sm:$0xff] %vm304_vm2, %v1994_v41  ;;  %701 = vperm.xlu0 %1461, %v1994_v41  }
 0x1ec   : > { %v676_v45 = vpop.xlane.xlu0 %675  ;;  %v679_v46 = vpop.xlane.xlu1 %678 }
 0x1ed   : > { %v684_v47 = vmax.f32 %v1996_v42, %v676_v45  ;;  %v685_v48 = vmax.f32 %v1998_v43, %v679_v46  ;;  %v691_v17 = vmul.f32 1.442695, %v687_v44  ;;  %v761_v46 = vld [vmem:[#allocation4 + $0x8] sm:$0xff] }
 0x1ef   : > { %v688_v50 = vsub.f32 %v1996_v42, %v684_v47  ;;  %1089 = vst.msk [vmem:[#allocation2 + $0x8] sm:$0xff] %vm304_vm2, %v684_v47  ;;  %706 = vperm.xlu1 %1462, %v684_v47   ;;  %v689_v51 = vsub.f32 %v1998_v43, %v685_v48  ;;  %1090 = vst.msk [vmem:[#allocation2 + $0x10] sm:$0xff] %vm304_vm2, %v685_v48  ;;  %v760_v43 = vld [vmem:[#allocation4] sm:$0xff] }
 0x1f0   : > { %v682_v52 = vpop.xlane.xlu1 %681 }
 0x1f1   : > { %v686_v53 = vmax.f32 %v2007_v49, %v682_v52  ;;  %v693_v15 = vmul.f32 1.442695, %v688_v50 }
 0x1f3   : > { %711 = vperm.xlu1 %1462, %v685_v48   ;;  %v690_v54 = vsub.f32 %v2007_v49, %v686_v53  ;;  %1091 = vst.msk [vmem:[#allocation2 + $0x18] sm:$0xff] %vm304_vm2, %v686_v53 }
 0x1f5   : > { %v697_v18 = vmul.f32 1.442695, %v690_v54 }
 0x1f7   : > { %716 = vperm.xlu1 %1462, %v686_v53   ;;  %v762_v53 = vld [vmem:[#allocation4 + $0x10] sm:$0xff] }
 0x26a   : > { %v702_v57 = vpop.permute.xlu0 %701 }
 0x26b   : > { %v719_v58 = vsub.f32 %v435_v23, %v702_v57  ;;  %v731_v23 = vld [vmem:[#allocation3] sm:$0xff] }
 0x26d   : > { %v723_v59 = vmul.f32 1.442695, %v719_v58  ;;  %v763_v58 = vld [vmem:[#allocation4 + $0x18] sm:$0xff] }
 0x26e   : > { %v707_v60 = vpop.permute.xlu1 %706 }
 0x26f   : > { %1463 = vpow2.f32 %v723_v59  ;;  %v720_v61 = vsub.f32 %v511_v26, %v707_v60  ;;  %v732_v26 = vld [vmem:[#allocation3 + $0x8] sm:$0xff] }
 0x271   : > { %v725_v62 = vmul.f32 1.442695, %v720_v61 }
 0x272   : > { %v712_v63 = vpop.permute.xlu1 %711 }
 0x273   : > { %1465 = vpow2.f32 %v725_v62  ;;  %v721_v1 = vsub.f32 %v587_v30, %v712_v63  ;;  %v733_v30 = vld [vmem:[#allocation3 + $0x10] sm:$0xff] }
 0x275   : > { %v727_v2 = vmul.f32 1.442695, %v721_v1 }
 0x276   : > { %v717_v3 = vpop.permute.xlu1 %716 }
 0x277   : > { %1467 = vpow2.f32 %v727_v2  ;;  %v722_v4 = vsub.f32 %v663_v34, %v717_v3  ;;  %v734_v34 = vld [vmem:[#allocation3 + $0x18] sm:$0xff] }
 0x279   : > { %v1464_v6 = vpop.eup %1463  ;;  %v729_v7 = vmul.f32 1.442695, %v722_v4 }
 0x27a   : > { %1364 = vmatmul.mubr.msk.f32.vlgmr.msra.gmra.mrb[4].mxu0 %vm670_vm4, %v1464_v6  ;;  %v739_v8 = vsel %vm670_vm4, %v1464_v6, 0.0 }
 0x27b   : > { %1469 = vpow2.f32 %v729_v7  ;;  %740 = vadd.xlane.f32.xlu1 %v739_v8  ;;  %1372 = vmatpush3.msra.mxu0 %v348_v5 }
 0x27c   : > { %1373 = vmatprep.mubr.msk.f32.mxu0 %vm1671_vm1, %v1670_v0  ;;  %1471 = vpow2.f32 %v693_v15 }
 0x27d   : > { %v1466_v10 = vpop.eup %1465  ;;  %1473 = vpow2.f32 %v691_v17 }
 0x27e   : > { %1369 = vmatmul.mubr.msk.f32.vlgmr.msra.gmra.mrb[4].mxu1 %vm670_vm4, %v1466_v10  ;;  %v742_v11 = vsel %vm670_vm4, %v1466_v10, 0.0 }
 0x27f   : > { %743 = vadd.xlane.f32.xlu0 %v742_v11  ;;  %1377 = vmatpush3.msra.mxu1 %v349_v9 }
 0x280   : > { %1378 = vmatprep.mubr.msk.f32.mxu1 %vm1671_vm1, %v1670_v0  ;;  %v695_v0 = vmul.f32 1.442695, %v689_v51 }
 0x281   : > { %v1468_v12 = vpop.eup %1467 }
 0x282   : > { %1374 = vmatmul.mubr.msk.f32.vlgmr.msra.gmra.mrb[6].mxu0 %vm670_vm4, %v1468_v12  ;;  %v745_v13 = vsel %vm670_vm4, %v1468_v12, 0.0  ;;  %1475 = vpow2.f32 %v695_v0 }
 0x283   : > { %746 = vadd.xlane.f32.xlu1 %v745_v13  ;;  %1477 = vpow2.f32 %v697_v18 }
 0x285   : > { %v1470_v14 = vpop.eup %1469 }
 0x286   : > { %1379 = vmatmul.mubr.msk.f32.vlgmr.msra.gmra.mrb[6].mxu1 %vm670_vm4, %v1470_v14  ;;  %v748_v16 = vsel %vm670_vm4, %v1470_v14, 0.0  ;;  %v1472_v19 = vpop.eup %1471 }
 0x287   : > { %749 = vadd.xlane.f32.xlu1 %v748_v16  ;;  %v1474_v20 = vpop.eup %1473  ;;  %v736_v28 = vmul.f32 %v1472_v19, %v732_v26 }
 0x288   : > { %v735_v24 = vmul.f32 %v1474_v20, %v731_v23 }
 0x28c   : > { %v1476_v21 = vpop.eup %1475 }
 0x28d   : > { %v1478_v22 = vpop.eup %1477  ;;  %v737_v32 = vmul.f32 %v1476_v21, %v733_v30 }
 0x28e   : > { %v738_v37 = vmul.f32 %v1478_v22, %v734_v34 }
 0x295   : > { %771 = vperm.xlu0 %1461, %v1472_v19  }
 0x298   : > { %766 = vperm.xlu1 %1462, %v1474_v20  }
 0x29c   : > { %776 = vperm.xlu1 %1462, %v1476_v21  }
 0x2a0   : > { %781 = vperm.xlu1 %1462, %v1478_v22  }
 0x308   : > { %v741_v25 = vpop.xlane.xlu1 %740 }
 0x309   : > { %v751_v27 = vadd.f32 %v741_v25, %v735_v24 }
 0x30b   : > { %756 = vst.msk [vmem:[#allocation3] sm:$0xff] %vm304_vm2, %v751_v27 }
 0x30c   : > { %v744_v29 = vpop.xlane.xlu0 %743 }
 0x30d   : > { %v752_v31 = vadd.f32 %v744_v29, %v736_v28 }
 0x30f   : > { %757 = vst.msk [vmem:[#allocation3 + $0x8] sm:$0xff] %vm304_vm2, %v752_v31 }
 0x310   : > { %v747_v33 = vpop.xlane.xlu1 %746 }
 0x311   : > { %v753_v35 = vadd.f32 %v747_v33, %v737_v32 }
 0x312   : > { %v1099_v36 = vld [vmem:[#allocation3] sm:$0xff] }
 0x313   : > { %758 = vst.msk [vmem:[#allocation3 + $0x10] sm:$0xff] %vm304_vm2, %v753_v35  ;;  %1105 = vperm.xlu1 %1462, %v1099_v36  }
 0x314   : > { %v750_v38 = vpop.xlane.xlu1 %749  ;;  %v772_v47 = vpop.permute.xlu0 %771 }
 0x315   : > { %v754_v39 = vadd.f32 %v750_v38, %v738_v37  ;;  %v785_v52 = vmul.f32 %v772_v47, %v761_v46 }
 0x316   : > { %v1100_v40 = vld [vmem:[#allocation3 + $0x8] sm:$0xff] }
 0x317   : > { %759 = vst.msk [vmem:[#allocation3 + $0x18] sm:$0xff] %vm304_vm2, %v754_v39  ;;  %1110 = vperm.xlu0 %1461, %v1100_v40  }
 0x318   : > { %v767_v44 = vpop.permute.xlu1 %766 }
 0x319   : > { %v784_v45 = vmul.f32 %v767_v44, %v760_v43 }
 0x31a   : > { %v1101_v41 = vld [vmem:[#allocation3 + $0x10] sm:$0xff] }
 0x31b   : > { %1115 = vperm.xlu1 %1462, %v1101_v41  }
 0x31c   : > { %v777_v51 = vpop.permute.xlu1 %776 }
 0x31d   : > { %v786_v57 = vmul.f32 %v777_v51, %v762_v53 }
 0x31e   : > { %v1102_v42 = vld [vmem:[#allocation3 + $0x18] sm:$0xff] }
 0x31f   : > { %1120 = vperm.xlu0 %1461, %v1102_v42  }
 0x320   : > { %v782_v59 = vpop.permute.xlu1 %781 }
 0x321   : > { %v787_v63 = vmul.f32 %v782_v59, %v763_v58 }
 0x34d   : > { %v857_v48 = vpop.f32.mrb[4].mxu0 }
 0x34e   : > { %v1080_v49 = vadd.f32 %v857_v48, %v784_v45  ;;  %v1365_v50 = vpop.f32.mrb[5].mxu0 }
 0x350   : > { %1084 = vst.msk [vmem:[#allocation4] sm:$0xff] %vm313_vm0, %v1080_v49 }
 0x351   : > { %v930_v54 = vpop.f32.mrb[4].mxu1 }
 0x352   : > { %v1081_v55 = vadd.f32 %v930_v54, %v785_v52  ;;  %v1370_v56 = vpop.f32.mrb[5].mxu1 }
 0x354   : > { %1085 = vst.msk [vmem:[#allocation4 + $0x8] sm:$0xff] %vm313_vm0, %v1081_v55 }
 0x355   : > { %v1003_v60 = vpop.f32.mrb[6].mxu0 }
 0x356   : > { %v1082_v61 = vadd.f32 %v1003_v60, %v786_v57  ;;  %v1375_v62 = vpop.f32.mrb[7].mxu0 }
 0x357   : > { %v1095_v8 = vld [vmem:[#allocation4] sm:$0xff] }
 0x358   : > { %1086 = vst.msk [vmem:[#allocation4 + $0x10] sm:$0xff] %vm313_vm0, %v1082_v61 }
 0x359   : > { %v1076_v1 = vpop.f32.mrb[6].mxu1 }
 0x35a   : > { %v1083_v2 = vadd.f32 %v1076_v1, %v787_v63  ;;  %v1380_v3 = vpop.f32.mrb[7].mxu1 }
 0x35b   : > { %v1096_v12 = vld [vmem:[#allocation4 + $0x8] sm:$0xff] }
 0x35c   : > { %1087 = vst.msk [vmem:[#allocation4 + $0x18] sm:$0xff] %vm313_vm0, %v1083_v2 }
 0x35f   : > { %v1097_v15 = vld [vmem:[#allocation4 + $0x10] sm:$0xff] }
 0x363   : > { %v1098_v0 = vld [vmem:[#allocation4 + $0x18] sm:$0xff] }
 0x392   : > { %v1106_v4 = vpop.permute.xlu1 %1105 }
 0x393   : > { %1479 = vrcp.f32 %v1106_v4 }
 0x396   : > { %v1111_v5 = vpop.permute.xlu0 %1110 }
 0x397   : > { %1481 = vrcp.f32 %v1111_v5 }
 0x39a   : > { %v1116_v6 = vpop.permute.xlu1 %1115 }
 0x39b   : > { %1483 = vrcp.f32 %v1116_v6 }
 0x39d   : > { %v1480_v7 = vpop.eup %1479 }
 0x39e   : > { %v1124_v9 = vmul.f32 %v1480_v7, %v1095_v8  ;;  %v1121_v10 = vpop.permute.xlu0 %1120 }
 0x39f   : > { %1485 = vrcp.f32 %v1121_v10 }
 0x3a0   : > { %1132 = vst.msk [vmem:[%s295_s24] sm:$0xff] %vm313_vm0, %v1124_v9 }
 0x3a1   : > { %v1482_v11 = vpop.eup %1481 }
 0x3a2   : > { %v1126_v13 = vmul.f32 %v1482_v11, %v1096_v12 }
 0x3a4   : > { %1133 = vst.msk [vmem:[%s295_s24 + $0x8] sm:$0xff] %vm313_vm0, %v1126_v13 }
 0x3a5   : > { %v1484_v14 = vpop.eup %1483 }
 0x3a6   : > { %v1128_v16 = vmul.f32 %v1484_v14, %v1097_v15 }
 0x3a8   : > { %1134 = vst.msk [vmem:[%s295_s24 + $0x10] sm:$0xff] %vm313_vm0, %v1128_v16 }
 0x3a9   : > { %v1486_v17 = vpop.eup %1485 }
 0x3aa   : > { %v1130_v18 = vmul.f32 %v1486_v17, %v1098_v0 }
 0x3ac   : > { %1135 = vst.msk [vmem:[%s295_s24 + $0x18] sm:$0xff] %vm313_vm0, %v1130_v18 }
 0x3ad   : > { %1590 = shalt.err (!%p1587_p13)
}
 0x3ae   : > { %s1591_s28 = scalar_lea.hbm %s2050_s30, 512  ;;  %s1595_s10 = scalar_lea.hbm %s2105_s3, 1024 }
 0x3af   : > { %p1592_p11 = scmp.ne.s32.totalorder %s2050_s30, %s1591_s28  ;;  %p1596_p7 = scmp.lt.u32.totalorder %s2050_s30, %s2105_s3 }
 0x3b0   : > { %p1597_p4 = scmp.lt.u32.totalorder %s1595_s10, %s1591_s28  ;;  %p1599_p0 = scmp.lt.u32.totalorder %s1591_s28, %s2050_s30 }
 0x3b1   : > { %p1593_p2 = pnand %p1592_p11, %p2134_p10 }
 0x3b2   : > { %p1598_p3 = por %p1597_p4, %p1596_p7 }
 0x3b3   : > { %p1594_p5 = pneg %p1593_p2 }
 0x3b4   : > { %p1600_p8 = por %p1599_p0, %p1598_p3 }
 0x3b6   : > { %p1601_p9 = pnand %p1600_p8, %p1594_p5 }
 0x3b8   : > { %1604 = shalt.err (!%p1601_p9)
}
 0x3b9   : > { %s1675_s11 = smov 128   ;;  %s1676_s19 = smov 8  }
 0x3ba   : > { %1387 = dma.vmem_to_hbm [thread:$0]  (%p2134_p10), %s2052_s20, 512, %s2050_s30, %s1137_s6, %s1675_s11, %s1675_s11, %s1676_s19  }
 0x3bb PF: > { %s1166_s9 = sand.u32 1, %s1643_s12   ;;  %p2135_p12 = scmp.ne.s32.totalorder %s2122_s27, 0 }
 0x3bc   : > { %p2136_p1 = scmp.ge.s32.totalorder %s1663_s17, 2  ;;  %s1167_s18 = scalar_lea.sflag [#allocation8], %s1166_s9 }
 0x3be   : > { %p1400_p6 = pnand %p2136_p1, %p2135_p12 }
 0x3c0   : > { %1638 = dma.done.wait (!%p1400_p6), %s1167_s18, 512  }
 0x3c1   : > { %1640 = vsyncadd (!%p1400_p6), %s1167_s18, 4294966784  ;;  %s22_s17 = sadd.s32 1, %s1663_s17   ;;  %s2137_s24 = sld [smem:[#allocation18_spill]] }
 0x3c2   : > { %p19_p13 = scmp.ge.s32.totalorder %s22_s17, 4   ;;  %s2138_s15 = sld [smem:[#allocation16_spill]] }
 0x3c3   : > { %s2139_s16 = sld [smem:[#allocation17_spill]]  ;;  %s2140_s12 = smov %s1647_s13 }
 0x3c4   : > { %s2141_s13 = smov %s1651_s14  ;;  %21 = sbr.rel (!%p19_p13) target bundleno = 10 (0xa), region = 113 }
 0x3c7   : > { %s2142_s14 = smov %s2137_s24 }
 0x3cb   :  { %1172 = vsyncpa [#allocation7], 1 }
 0x3cc   :  { %1174 = vsyncpa [#allocation7 + $0x1], 1 }
 0x3cd   :  { %1175 = vsyncpa [#allocation10], 1 }
 0x3ce   :  { %1177 = vsyncpa [#allocation10 + $0x1], 1 }
 0x3cf   :  { %1178 = vsyncpa [#allocation8], 1 }
 0x3d0   :  { %1180 = vsyncpa [#allocation8 + $0x1], 1 }

</bundles_post_ra>
